<compile_context>
chip_gen: v7x
topology: tpu7x:2x2x1
jax: 0.10.0
libtpu: 0.0.40
codegen_flags: <defaults>
</compile_context>

<pallas_src>
import functools

import jax
import jax.numpy as jnp
import numpy as np
from jax.experimental import pallas as pl
from jax.experimental.pallas import tpu as pltpu


def _round_up(x, m):
    return (x + m - 1) // m * m


def _lr_kernel(klo_ref, khi_ref, starts_ref, ends_ref, x_hbm, out_ref,
               x_vmem, acc_ref, copy_sem, *, tk):
    # klo_ref / khi_ref : (B, n_mt) int32 in SMEM (scalar prefetch)
    # starts_ref/ends_ref: (1, 1, t_pad) int32 (VMEM-resident across m)
    # x_hbm             : (B, t_pad, d_pad) raw HBM ref (memory_space=pl.ANY)
    # out_ref           : (1, tm, d_pad) output tile (written once per (b, m))
    # x_vmem            : (t_pad, d_pad) single-buffered resident copy of x[b]
    # acc_ref           : (tm, d_pad) f32 accumulator
    b = pl.program_id(0)
    m = pl.program_id(1)
    tm = out_ref.shape[1]
    tile_t0 = m * tm

    # Load this batch's phoneme activations into VMEM once per batch (single
    # buffered: one resident copy, not the BlockSpec double-buffer).
    @pl.when(m == 0)
    def _load_x():
        cp = pltpu.make_async_copy(x_hbm.at[b], x_vmem, copy_sem)
        cp.start()
        cp.wait()

    acc_ref[...] = jnp.zeros_like(acc_ref)

    # Grid-invariant frame-index iota, hoisted out of the K loop; the per-tile
    # offset is folded into the (1, tk) starts/ends instead of a (tm, tk) add.
    t_idx = jax.lax.broadcasted_iota(jnp.int32, (tm, tk), 0)

    def body(k, carry):
        off = pl.multiple_of(k * tk, tk)
        starts = starts_ref[0, 0:1, pl.ds(off, tk)] - tile_t0   # (1, tk)
        ends = ends_ref[0, 0:1, pl.ds(off, tk)] - tile_t0       # (1, tk)
        # One-hot expansion matrix: W[t, i] = 1 iff phoneme i covers frame t.
        w = ((t_idx >= starts) & (t_idx < ends)).astype(x_vmem.dtype)  # (tm, tk)
        xt = x_vmem[pl.ds(off, tk), :]                                  # (tk, d_pad)
        acc_ref[...] += jnp.dot(w, xt, preferred_element_type=jnp.float32)
        return carry

    # Visit only the phoneme tiles whose frame band intersects this mel tile.
    jax.lax.fori_loop(klo_ref[b, m], khi_ref[b, m], body, 0)

    out_ref[0, :, :] = acc_ref[...].astype(out_ref.dtype)


def length_regulator(x, duration, max_len, *, tile_m=256, tile_k=256):
    """x: (B, T, D) float; duration: (B, T) int; max_len: static int.

    Returns (output (B, max_len, D), mel_len (B,) int32).
    """
    B, T, D = x.shape
    duration = duration.astype(jnp.int32)

    # --- tiling / padding choices (lane-dense D, MXU-matched K and M) --------
    tk = _round_up(max(int(tile_k), 128), 128)
    t_pad = _round_up(T, tk)
    n_kt = t_pad // tk
    d_pad = _round_up(D, 128)
    if max_len >= 128:
        tm = _round_up(min(max(int(tile_m), 128), _round_up(max_len, 128)), 128)
    else:
        tm = _round_up(max_len, 16)
    ml_pad = _round_up(max_len, tm)
    n_mt = ml_pad // tm

    # --- host-side glue: cumulative durations + band bounds per (b, m) -------
    dur_pad = jnp.pad(duration, ((0, 0), (0, t_pad - T)))      # padded dur = 0
    cum_incl = jnp.cumsum(dur_pad, axis=1)                     # (B, t_pad)
    cum_excl = cum_incl - dur_pad
    starts = cum_excl[:, None, :]                              # (B, 1, t_pad)
    ends = cum_incl[:, None, :]                                # (B, 1, t_pad)

    # Frame range covered by each phoneme tile (both nondecreasing in k).
    blk_lo = cum_excl.reshape(B, n_kt, tk)[:, :, 0]            # (B, n_kt)
    blk_hi = cum_incl.reshape(B, n_kt, tk)[:, :, -1]           # (B, n_kt)
    mel_t0 = jnp.arange(n_mt, dtype=jnp.int32) * tm            # (n_mt,)
    # First/one-past-last phoneme tile intersecting each mel tile.
    k_lo = jnp.sum(blk_hi[:, None, :] <= mel_t0[None, :, None],
                   axis=2, dtype=jnp.int32)                    # (B, n_mt)
    k_hi = jnp.sum(blk_lo[:, None, :] < (mel_t0 + tm)[None, :, None],
                   axis=2, dtype=jnp.int32)                    # (B, n_mt)

    x_pad = jnp.pad(x, ((0, 0), (0, t_pad - T), (0, d_pad - D)))
    mel_len = jnp.sum(duration, axis=1).astype(jnp.int32)

    # --- VMEM budget (x single-buffered + out double-buffered + scratch) -----
    itemsize = jnp.dtype(x.dtype).itemsize
    needed = (t_pad * d_pad * itemsize          # resident x (1 buffer)
              + 2 * tm * d_pad * itemsize       # out tile (2 buffers)
              + tm * d_pad * 4                  # f32 accumulator
              + 2 * 2 * t_pad * 4)              # starts + ends
    try:
        vmem_cap = int(pltpu.get_tpu_info().vmem_capacity_bytes)
    except Exception:
        vmem_cap = 64 * 1024 * 1024             # conservative (v7x per-TC)
    vmem_limit = int(min(max(needed + (4 << 20), 32 << 20),
                         max(vmem_cap - (4 << 20), 16 << 20)))

    # Band-aware (not dense) advisory cost.
    band_tiles = min(n_kt, pl.cdiv(tm, tk) + 1)
    flops = 2 * B * n_mt * band_tiles * tm * tk * d_pad
    bytes_accessed = (B * (t_pad * d_pad + ml_pad * d_pad) * itemsize
                      + B * 2 * t_pad * 4 + 2 * B * n_mt * 4)

    out = pl.pallas_call(
        functools.partial(_lr_kernel, tk=tk),
        out_shape=jax.ShapeDtypeStruct((B, ml_pad, d_pad), x.dtype),
        grid_spec=pltpu.PrefetchScalarGridSpec(
            num_scalar_prefetch=2,
            grid=(B, n_mt),
            in_specs=[
                pl.BlockSpec((1, 1, t_pad), lambda b, m, klo, khi: (b, 0, 0)),
                pl.BlockSpec((1, 1, t_pad), lambda b, m, klo, khi: (b, 0, 0)),
                pl.BlockSpec(memory_space=pl.ANY),
            ],
            out_specs=pl.BlockSpec((1, tm, d_pad),
                                   lambda b, m, klo, khi: (b, m, 0)),
            scratch_shapes=[
                pltpu.VMEM((t_pad, d_pad), x.dtype),      # resident x[b]
                pltpu.VMEM((tm, d_pad), jnp.float32),     # f32 accumulator
                pltpu.SemaphoreType.DMA(()),              # x load semaphore
            ],
        ),
        compiler_params=pltpu.CompilerParams(
            dimension_semantics=("parallel", "arbitrary"),
            vmem_limit_bytes=vmem_limit),
        cost_estimate=pl.CostEstimate(
            flops=flops, transcendentals=0, bytes_accessed=bytes_accessed),
    )(k_lo, k_hi, starts, ends, x_pad)

    return out[:, :max_len, :D], mel_len


def _reference(x, duration, max_len):
    """Pure numpy reference of the intended LengthRegulator semantics."""
    x = np.asarray(x)
    duration = np.asarray(duration)
    B, T, D = x.shape
    out = np.zeros((B, max_len, D), dtype=x.dtype)
    mel_len = np.zeros((B,), dtype=np.int32)
    for b in range(B):
        expanded = np.repeat(x[b], duration[b], axis=0)   # (sum(dur), D)
        mel_len[b] = expanded.shape[0]
        n = min(expanded.shape[0], max_len)
        out[b, :n] = expanded[:n]
    return out, mel_len


def _check(out, mel_len, x, duration, max_len):
    out = jax.block_until_ready(out)
    mel_len = jax.block_until_ready(mel_len)
    ref_out, ref_len = _reference(x, duration, max_len)
    np.testing.assert_allclose(np.asarray(out), ref_out, rtol=1e-5, atol=1e-5)
    np.testing.assert_array_equal(np.asarray(mel_len), ref_len)


if __name__ == "__main__":
    key = jax.random.PRNGKey(0)
    kx, kd, kx3, kd3 = jax.random.split(key, 4)

    B, T, D = 2, 8, 32
    x = jax.random.normal(kx, (B, T, D), dtype=jnp.float32)
    duration = jax.random.randint(kd, (B, T), 0, 5, dtype=jnp.int32)

    # Config 1: several mel tiles, most with an empty band (exercises the
    # zero-trip in-kernel K loop + zero-filled tiles).
    out1, len1 = length_regulator(x, duration, 384, tile_m=128)
    _check(out1, len1, x, duration, 384)

    # Config 2: small max_len, truncation path, single sub-128 mel tile.
    out2, len2 = length_regulator(x, duration, 16)
    _check(out2, len2, x, duration, 16)

    # Config 3: multiple phoneme (K) tiles and multiple mel tiles (exercises
    # the band intersection and resident-x reuse across m).
    B3, T3, D3 = 2, 160, 32
    x3 = jax.random.normal(kx3, (B3, T3, D3), dtype=jnp.float32)
    dur3 = jax.random.randint(kd3, (B3, T3), 0, 3, dtype=jnp.int32)
    out3, len3 = length_regulator(x3, dur3, 256, tile_m=128, tile_k=128)
    _check(out3, len3, x3, dur3, 256)

    print("KERNEL_OK")
</pallas_src>

<mosaic_0001>
module attributes {stable_mosaic.version = 11 : i64} {
  func.func @_lr_kernel(%arg0: i32, %arg1: i32, %arg2: memref<2x3xi32, #tpu.memory_space<smem>>, %arg3: memref<2x3xi32, #tpu.memory_space<smem>>, %arg4: memref<1x1x256xi32, #tpu.memory_space<vmem>>, %arg5: memref<1x1x256xi32, #tpu.memory_space<vmem>>, %arg6: memref<2x256x128xf32, #tpu.memory_space<any>>, %arg7: memref<1x128x128xf32, #tpu.memory_space<vmem>>, %arg8: memref<256x128xf32, #tpu.memory_space<vmem>>, %arg9: memref<128x128xf32, #tpu.memory_space<vmem>>, %arg10: memref<!tpu.dma_semaphore, #tpu.memory_space<semaphore_mem>>) attributes {dimension_semantics = [#tpu.dimension_semantics<parallel>, #tpu.dimension_semantics<arbitrary>], iteration_bounds = array<i64: 2, 3>, scalar_prefetch = 2 : i64, scratch_operands = 3 : i64, tpu.core_type = #tpu.core_type<tc>, window_params = [{transform_indices = @transform_0, window_bounds = array<i64: 1, 1, 256>}, {transform_indices = @transform_1, window_bounds = array<i64: 1, 1, 256>}, {}, {transform_indices = @transform_3, window_bounds = array<i64: 1, 128, 128>}]} {
    %c128_i32 = arith.constant 128 : i32
    %0 = arith.muli %arg1, %c128_i32 : i32
    %c0_i32 = arith.constant 0 : i32
    %1 = arith.cmpi eq, %arg1, %c0_i32 : i32
    %2 = arith.extui %1 : i1 to i32
    %c0_i32_0 = arith.constant 0 : i32
    %3 = arith.cmpi ne, %2, %c0_i32_0 : i32
    scf.if %3 {
      %c0_i32_8 = arith.constant 0 : i32
      %c0_i32_9 = arith.constant 0 : i32
      %19 = tpu.memref_slice %arg6[%arg0, %c0_i32_8, %c0_i32_9] : memref<2x256x128xf32, #tpu.memory_space<any>> -> memref<1x256x128xf32, #tpu.memory_space<any>>
      %20 = tpu.memref_squeeze %19 : memref<1x256x128xf32, #tpu.memory_space<any>> -> memref<256x128xf32, #tpu.memory_space<any>>
      tpu.enqueue_dma source(%20 : memref<256x128xf32, #tpu.memory_space<any>>) target(%arg8 : memref<256x128xf32, #tpu.memory_space<vmem>>) target_semaphore(%arg10 : memref<!tpu.dma_semaphore, #tpu.memory_space<semaphore_mem>>)
      %c0_i32_10 = arith.constant 0 : i32
      %c0_i32_11 = arith.constant 0 : i32
      %21 = tpu.memref_slice %arg6[%arg0, %c0_i32_10, %c0_i32_11] : memref<2x256x128xf32, #tpu.memory_space<any>> -> memref<1x256x128xf32, #tpu.memory_space<any>>
      %22 = tpu.memref_squeeze %21 : memref<1x256x128xf32, #tpu.memory_space<any>> -> memref<256x128xf32, #tpu.memory_space<any>>
      tpu.wait_dma2 semaphore(%arg10 : memref<!tpu.dma_semaphore, #tpu.memory_space<semaphore_mem>>) src(%22 : memref<256x128xf32, #tpu.memory_space<any>>) dst(%arg8 : memref<256x128xf32, #tpu.memory_space<vmem>>)
    } else {
    }
    %cst = arith.constant 0.000000e+00 : f32
    %4 = vector.broadcast %cst : f32 to vector<128x128xf32>
    %c0 = arith.constant 0 : index
    %c0_1 = arith.constant 0 : index
    %5 = vector.load %arg9[%c0, %c0_1] : memref<128x128xf32, #tpu.memory_space<vmem>>, vector<128x128xf32>
    tpu.vector_store %arg9[%c0, %c0_1], %4 {strides = array<i32>} : memref<128x128xf32, #tpu.memory_space<vmem>>, vector<128x128xf32>,
    %6 = tpu.iota {dimensions = array<i32: 0>} : vector<128x256xi32>
    %7 = arith.index_cast %arg0 : i32 to index
    %8 = arith.index_cast %arg1 : i32 to index
    %9 = memref.load %arg2[%7, %8] : memref<2x3xi32, #tpu.memory_space<smem>>
    %10 = arith.index_cast %arg0 : i32 to index
    %11 = arith.index_cast %arg1 : i32 to index
    %12 = memref.load %arg3[%10, %11] : memref<2x3xi32, #tpu.memory_space<smem>>
    %c0_i32_2 = arith.constant 0 : i32
    %13 = arith.subi %12, %9 : i32
    %14 = arith.addi %9, %13 : i32
    %c1_i32 = arith.constant 1 : i32
    scf.for %arg11 = %9 to %14 step %c1_i32  : i32 {
      %c256_i32 = arith.constant 256 : i32
      %19 = arith.muli %arg11, %c256_i32 : i32
      %20 = tpu.assume_multiple %19, 256 : i32
      %c0_8 = arith.constant 0 : index
      %c0_9 = arith.constant 0 : index
      %21 = arith.index_cast %20 : i32 to index
      %22 = vector.load %arg4[%c0_8, %c0_9, %21] : memref<1x1x256xi32, #tpu.memory_space<vmem>>, vector<1x1x256xi32>
      %23 = vector.shape_cast %22 : vector<1x1x256xi32> to vector<1x256xi32>
      %24 = vector.broadcast %0 : i32 to vector<1x256xi32>
      %25 = arith.subi %23, %24 : vector<1x256xi32>
      %c0_10 = arith.constant 0 : index
      %c0_11 = arith.constant 0 : index
      %26 = arith.index_cast %20 : i32 to index
      %27 = vector.load %arg5[%c0_10, %c0_11, %26] : memref<1x1x256xi32, #tpu.memory_space<vmem>>, vector<1x1x256xi32>
      %28 = vector.shape_cast %27 : vector<1x1x256xi32> to vector<1x256xi32>
      %29 = vector.broadcast %0 : i32 to vector<1x256xi32>
      %30 = arith.subi %28, %29 : vector<1x256xi32>
      %31 = vector.broadcast %25 : vector<1x256xi32> to vector<128x256xi32>
      %32 = arith.cmpi sge, %6, %31 : vector<128x256xi32>
      %33 = vector.broadcast %30 : vector<1x256xi32> to vector<128x256xi32>
      %34 = arith.cmpi slt, %6, %33 : vector<128x256xi32>
      %35 = arith.andi %32, %34 : vector<128x256xi1>
      %36 = arith.extui %35 : vector<128x256xi1> to vector<128x256xi32>
      %37 = arith.sitofp %36 : vector<128x256xi32> to vector<128x256xf32>
      %38 = arith.index_cast %20 : i32 to index
      %c0_12 = arith.constant 0 : index
      %39 = vector.load %arg8[%38, %c0_12] : memref<256x128xf32, #tpu.memory_space<vmem>>, vector<256x128xf32>
      %c0_13 = arith.constant 0 : index
      %c0_14 = arith.constant 0 : index
      %40 = vector.load %arg9[%c0_13, %c0_14] : memref<128x128xf32, #tpu.memory_space<vmem>>, vector<128x128xf32>
      %cst_15 = arith.constant dense<0.000000e+00> : vector<128x128xf32>
      %41 = tpu.matmul %37, %39, %cst_15 {dimension_numbers = #tpu.dot_dimension_numbers<[1], [0], [0], [1], [0, 0, 1, 1], [], []>} : vector<128x256xf32>, vector<256x128xf32>, vector<128x128xf32> -> vector<128x128xf32>
      %42 = arith.addf %40, %41 : vector<128x128xf32>
      %c0_16 = arith.constant 0 : index
      %c0_17 = arith.constant 0 : index
      %43 = vector.load %arg9[%c0_16, %c0_17] : memref<128x128xf32, #tpu.memory_space<vmem>>, vector<128x128xf32>
      tpu.vector_store %arg9[%c0_16, %c0_17], %42 {strides = array<i32>} : memref<128x128xf32, #tpu.memory_space<vmem>>, vector<128x128xf32>,
    }
    %c0_3 = arith.constant 0 : index
    %c0_4 = arith.constant 0 : index
    %15 = vector.load %arg9[%c0_3, %c0_4] : memref<128x128xf32, #tpu.memory_space<vmem>>, vector<128x128xf32>
    %c0_5 = arith.constant 0 : index
    %c0_6 = arith.constant 0 : index
    %c0_7 = arith.constant 0 : index
    %16 = vector.load %arg7[%c0_5, %c0_6, %c0_7] : memref<1x128x128xf32, #tpu.memory_space<vmem>>, vector<1x128x128xf32>
    %17 = vector.shape_cast %16 : vector<1x128x128xf32> to vector<128x128xf32>
    %18 = vector.shape_cast %15 : vector<128x128xf32> to vector<1x128x128xf32>
    tpu.vector_store %arg7[%c0_5, %c0_6, %c0_7], %18 {strides = array<i32>} : memref<1x128x128xf32, #tpu.memory_space<vmem>>, vector<1x128x128xf32>,
    return
  }
  func.func @transform_0(%arg0: i32, %arg1: i32, %arg2: memref<2x3xi32, #tpu.memory_space<smem>>, %arg3: memref<2x3xi32, #tpu.memory_space<smem>>) -> (i32, i32, i32) {
    %c0_i32 = arith.constant 0 : i32
    %c0_i32_0 = arith.constant 0 : i32
    %c0_i32_1 = arith.constant 0 : i32
    return %arg0, %c0_i32, %c0_i32_0 : i32, i32, i32
  }
  func.func @transform_1(%arg0: i32, %arg1: i32, %arg2: memref<2x3xi32, #tpu.memory_space<smem>>, %arg3: memref<2x3xi32, #tpu.memory_space<smem>>) -> (i32, i32, i32) {
    %c0_i32 = arith.constant 0 : i32
    %c0_i32_0 = arith.constant 0 : i32
    %c0_i32_1 = arith.constant 0 : i32
    return %arg0, %c0_i32, %c0_i32_0 : i32, i32, i32
  }
  func.func @transform_3(%arg0: i32, %arg1: i32, %arg2: memref<2x3xi32, #tpu.memory_space<smem>>, %arg3: memref<2x3xi32, #tpu.memory_space<smem>>) -> (i32, i32, i32) {
    %c0_i32 = arith.constant 0 : i32
    %c0_i32_0 = arith.constant 0 : i32
    return %arg0, %arg1, %c0_i32 : i32, i32, i32
  }
}

</mosaic_0001>

<bundles_post_ra>
// kernel: tpu_custom_call.1
= control target key start
LH: loop header
LB: loop body
LE: loop exit
PB: predicated region body
PF: predicated region fallthrough
CT: control target
= control target key end

     0   :  { %s1837_s0 = inlined_call_operand.hbm [shape: s32[2,3], index: 0, kind: input, shape index: {}]   ;;  %s1838_s2 = inlined_call_operand.vmem [shape: s32[2,1,256], index: 2, kind: input, shape index: {}]   ;;  %s1839_s3 = inlined_call_operand.vmem [shape: s32[2,1,256], index: 3, kind: input, shape index: {}]   ;;  %s1840_s4 = inlined_call_operand.hbm [shape: f32[2,256,128], index: 4, kind: input, shape index: {}]   ;;  %s1841_s5 = inlined_call_operand.hbm [shape: f32[2,384,128], index: 5, kind: output, shape index: {}]   ;;  %s1842_s1 = inlined_call_operand.vmem [shape: s32[2,3], index: 1, kind: input, shape index: {}]  }
   0x1   :  { %1847 = sst [smem:[#allocation19_spill]] %s1838_s2  ;;  %s1121_s20 = scalar_lea.hbm %s1837_s0, 32 }
   0x2   :  { %p1122_p0 = scmp.ne.s32.totalorder %s1837_s0, %s1121_s20  ;;  %p1125_p1 = scmp.lt.u32.totalorder %s1121_s20, %s1837_s0 }
   0x4   :  { %p1127_p2 = pnand %p1125_p1, %p1122_p0 }
   0x6   :  { %1130 = shalt.err (!%p1127_p2)  }
   0x7   :  { %s1281_s25 = smov [#allocation6]   ;;  %s12_s30 = sshll.u32 %s1842_s1, 4  ;;  %s13_s30 = int_to_ptr.vmem [resolvable:$true] %s12_s30 }
   0x8   :  { %11 = dma.hbm_to_smem %s1837_s0, 32, %s1281_s25, [#allocation5] }
   0x9   :  { %s1131_s6 = scalar_lea.vmem %s13_s30, 32  ;;  %p1136_p4 = scmp.lt.s32.totalorder %s13_s30, %s13_s30 }
   0xa   :  { %p1132_p3 = scmp.ne.s32.totalorder %s13_s30, %s1131_s6  ;;  %p1137_p5 = scmp.lt.s32.totalorder %s1131_s6, %s1131_s6 }
   0xc   :  { %p1138_p6 = por %p1137_p5, %p1136_p4 }
   0xe   :  { %p1139_p7 = pnand %p1138_p6, %p1132_p3 }
  0x10   :  { %1142 = shalt.err (!%p1139_p7)  }
  0x11   :  { %s1282_s7 = smov [#allocation7]  }
  0x12   :  { %15 = dma.vmem_to_smem %s13_s30, 32, %s1282_s7, [#allocation5] }
  0x13   :  { %1235 = dma.done.wait [#allocation5], 64 }
  0x14   :  { %1236 = vsyncadd [#allocation5], 4294967232 }
  0x15   :  { %17 = sfence }
  0x16   :  { %18 = vsyncpa [#allocation9], 0 }
  0x17   :  { %20 = vsyncpa [#allocation9 + $0x1], 0  ;;  %s1334_s0 = smov 0   ;;  %s1336_s8 = smov 0  }
  0x18   :  { %s1338_s1 = smov 0   ;;  %s1340_s9 = smov 0  }
  0x19   :  { %s1342_s10 = smov 0   ;;  %s1344_s11 = smov 0  }
  0x1a   :  { %s1346_s12 = smov 0   ;;  %s1348_s13 = smov 0  }
  0x1b LB: > { %s817_s14 = sadd.s32 4294967295, %s1275_s13   ;;  %s818_s15 = sadd.s32 4294967294, %s1275_s13   ;;  %s1275_s13 = sphi %s1348_s13, %s26_s13   ;;  %s1271_s12 = sphi %s1346_s12, %s1882_s12   ;;  %s1267_s11 = sphi %s1344_s11, %s1881_s11   ;;  %s1263_s10 = sphi %s1342_s10, %s1880_s10   ;;  %s1259_s9 = sphi %s1340_s9, %s1879_s9   ;;  %s1255_s1 = sphi %s1338_s1, %s1878_s1   ;;  %s1251_s8 = sphi %s1336_s8, %s1877_s8   ;;  %s1247_s0 = sphi %s1334_s0, %s1876_s0  }
  0x1c   : > { %s35_s16 = sadd.s32 1, %s1267_s11  ;;  %s38_s17 = sadd.s32 1, %s1271_s12 }
  0x1d   : > { %p36_p8 = scmp.ge.s32.totalorder %s35_s16, 3  ;;  %p109_p9 = scmp.ne.s32.totalorder %s1255_s1, %s1251_s8 }
  0x1e   : > { %p110_p10 = scmp.eq.s32.totalorder %s817_s14, 5  ;;  %p115_p13 = scmp.ne.s32.totalorder %s1251_s8, %s1247_s0 }
  0x1f   : > { %s1884_s16 = smov (%p36_p8, %s35_s16), 0  ;;  %s1886_s17 = smov (!%p36_p8, %s38_s17), %s1271_s12 }
  0x20   : > { %1848 = sst [smem:[#allocation17_spill]] %s1884_s16  ;;  %s95_s18 = ssub.s32 %s1267_s11, %s1884_s16 }
  0x21   : > { %p1385_p11 = por %p110_p10, %p109_p9  ;;  %p40_p12 = scmp.ge.s32.totalorder %s1886_s17, 2 }
  0x22   : > { %p116_p0 = scmp.eq.s32.totalorder %s818_s15, 5  ;;  %p821_p1 = scmp.ge.s32.totalorder %s1275_s13, 1 }
  0x23   : > { %s1849_s19 = scalar_select %p1385_p11, 1, 0 }
  0x24   : > { %s1888_s17 = smov (%p40_p12, %s1886_s17), 0  ;;  %p1394_p2 = por %p116_p0, %p115_p13 }
  0x25   : > { %1850 = sst [smem:[#allocation18_spill]] %s1888_s17  ;;  %p148_p3 = scmp.lt.s32.totalorder %s1275_s13, 7 }
  0x26   : > { %s1851_s20 = scalar_select %p1394_p2, 1, 0 }
  0x27   : > { %s94_s21 = ssub.s32 %s1271_s12, %s1888_s17  ;;  %s99_s22 = sadd.s32 1, %s1255_s1 }
  0x28   : > { %s96_s23 = sor.u32 %s95_s18, %s94_s21  ;;  %p149_p4 = pnand %p821_p1, %p148_p3 }
  0x29   : > { %p97_p5 = scmp.eq.s32.totalorder %s96_s23, 0  ;;  %s1843_s25 = sand.u32 (!%p149_p4), 1, %s1251_s8  }
  0x2a   : > { %152 = sbr.rel (%p149_p4) target bundleno = 405 (0x195), region = 28  ;;  %p173_p6 = scmp.lt.s32.totalorder (!%p149_p4), %s1263_s10, 1 }
  0x2b   : > { %s1403_s24 = scalar_select %p97_p5, %s1255_s1, %s99_s22  }
  0x2c   : > { %s1409_s26 = sshll.u32 (!%p149_p4), %s1843_s25, 7  ;;  %s901_s29 = sshll.u32 (!%p149_p4), %s1263_s10, 12 }
  0x2d   : > { %p1040_p7 = scmp.eq.s32.totalorder (!%p149_p4), %s1259_s9, 0  ;;  %s1852_s2 = sld [smem:[#allocation19_spill]] (!%p149_p4) }
  0x2e   : > { %s189_s25 = scalar_lea.hbm (!%p149_p4), %s1840_s4, %s901_s29  ;;  %s1283_s17 = smov (!%p149_p4), [#allocation2]  }
  0x2f   : > { %s197_s27 = sshll.u32 (!%p149_p4), %s1283_s17, 4  ;;  %s1143_s16 = scalar_lea.hbm (!%p149_p4), %s189_s25, 4096  ;;  %s198_s27 = int_to_ptr.vmem [resolvable:$true] %s197_s27 }
  0x30   : > { %p1144_p8 = scmp.ne.s32.totalorder (!%p149_p4), %s189_s25, %s1143_s16  ;;  %s1147_s7 = scalar_lea.hbm (!%p149_p4), %s1840_s4, 8192 }
  0x31   : > { %s174_s28 = scalar_select %p173_p6, %s1263_s10, 1 }
  0x32   : > { %p1145_p9 = pnand %p1144_p8, %p1040_p7  ;;  %p1148_p12 = scmp.lt.u32.totalorder %s189_s25, %s1840_s4 }
  0x33   : > { %s823_s30 = sshll.u32 %s174_s28, 1  ;;  %p1149_p13 = scmp.lt.u32.totalorder %s1147_s7, %s1143_s16 }
  0x34   : > { %s1418_s14 = scalar_lea.vmem %s1852_s2, %s823_s30  ;;  %s1423_s21 = scalar_lea.vmem %s1839_s3, %s823_s30 }
  0x35   : > { %p1146_p10 = pneg %p1145_p9  ;;  %p1150_p0 = por %p1149_p13, %p1148_p12 }
  0x36   : > { %p1151_p1 = scmp.lt.u32.totalorder %s1143_s16, %s189_s25 }
  0x38   : > { %p1152_p3 = por %p1151_p1, %p1150_p0 }
  0x3a   : > { %p1153_p4 = pnand %p1152_p3, %p1146_p10 }
  0x3c   : > { %1156 = shalt.err (!%p1153_p4)  }
  0x3d   : > { %s1157_s17 = scalar_lea.vmem %s198_s27, 4096  ;;  %p1164_p9 = scmp.lt.s32.totalorder %s198_s27, %s198_s27 }
  0x3e   : > { %p1158_p5 = scmp.ne.s32.totalorder %s198_s27, %s1157_s17  ;;  %p1165_p2 = scmp.lt.s32.totalorder %s1157_s17, %s1157_s17 }
  0x40   : > { %p1159_p6 = pnand %p1158_p5, %p1040_p7  ;;  %p1166_p11 = por %p1165_p2, %p1164_p9 }
  0x42   : > { %p1160_p8 = pneg %p1159_p6 }
  0x44   : > { %p1167_p12 = pnand %p1166_p11, %p1160_p8 }
  0x46   : > { %1170 = shalt.err (!%p1167_p12)  }
  0x47   : > { %1032 = dma.hbm_to_vmem [thread:$0]  (%p1040_p7), %s189_s25, 4096, %s198_s27, [#allocation4] }
  0x48   : > { %s1441_s2 = scalar_lea.vmem [#allocation8], %s1409_s26 }
  0x49   : > { %1238 = dma.done.wait (%p1040_p7), [#allocation4], 4096 }
  0x4a   : > { %1240 = vsyncadd (%p1040_p7), [#allocation4], 4294963200  ;;  %s237_s16 = sshra.s32 %s1259_s9, 7  ;;  %s242_s29 = sand.u32 127, %s1259_s9  ;;  %v220_v0 = vlaneseq  ;;  %v1284_v1 = vmov 0.0  }
  0x4b   : > { %s239_s30 = sadd.s32 %s1263_s10, %s237_s16  ;;  %204 = vst [vmem:[#allocation3] sm:$0xff] %v1284_v1  ;;  %205 = vst [vmem:[#allocation3 + $0x8] sm:$0xff] %v1284_v1 }
  0x4c   : > { %206 = vst [vmem:[#allocation3 + $0x10] sm:$0xff] %v1284_v1  ;;  %207 = vst [vmem:[#allocation3 + $0x18] sm:$0xff] %v1284_v1  ;;  %s829_s25 = sshll.u32 %s239_s30, 7  ;;  %v1450_v2 = vshrl.u32 %v220_v0, 7 }
  0x4d   : > { %208 = vst [vmem:[#allocation3 + $0x20] sm:$0xff] %v1284_v1  ;;  %209 = vst [vmem:[#allocation3 + $0x28] sm:$0xff] %v1284_v1  ;;  %s243_s26 = sadd.s32 %s829_s25, %s242_s29 }
  0x4e   : > { %210 = vst [vmem:[#allocation3 + $0x30] sm:$0xff] %v1284_v1  ;;  %211 = vst [vmem:[#allocation3 + $0x38] sm:$0xff] %v1284_v1  ;;  %s244_s27 = sld [smem:[#allocation6 + %s243_s26]]   ;;  %v1455_v3 = vadd.s32 8, %v1450_v2  ;;  %v1458_v4 = vadd.s32 16, %v1450_v2  ;;  %v1461_v5 = vadd.s32 24, %v1450_v2 }
  0x4f   : > { %212 = vst [vmem:[#allocation3 + $0x40] sm:$0xff] %v1284_v1  ;;  %213 = vst [vmem:[#allocation3 + $0x48] sm:$0xff] %v1284_v1  ;;  %s1452_s18 = sld [smem:[#allocation7 + %s243_s26]]  ;;  %v1464_v6 = vadd.s32 32, %v1450_v2  ;;  %v1467_v7 = vadd.s32 40, %v1450_v2  ;;  %v1470_v8 = vadd.s32 48, %v1450_v2 }
  0x50   : > { %214 = vst [vmem:[#allocation3 + $0x50] sm:$0xff] %v1284_v1  ;;  %215 = vst [vmem:[#allocation3 + $0x58] sm:$0xff] %v1284_v1  ;;  %v1473_v9 = vadd.s32 56, %v1450_v2  ;;  %v1476_v10 = vadd.s32 64, %v1450_v2  ;;  %v1479_v11 = vadd.s32 72, %v1450_v2  ;;  %v1482_v12 = vadd.s32 80, %v1450_v2 }
  0x51   : > { %216 = vst [vmem:[#allocation3 + $0x60] sm:$0xff] %v1284_v1  ;;  %217 = vst [vmem:[#allocation3 + $0x68] sm:$0xff] %v1284_v1  ;;  %v1485_v13 = vadd.s32 88, %v1450_v2  ;;  %v1488_v14 = vadd.s32 96, %v1450_v2  ;;  %v1491_v15 = vadd.s32 104, %v1450_v2  ;;  %v1494_v16 = vadd.s32 112, %v1450_v2 }
  0x52   : > { %218 = vst [vmem:[#allocation3 + $0x70] sm:$0xff] %v1284_v1  ;;  %219 = vst [vmem:[#allocation3 + $0x78] sm:$0xff] %v1284_v1  ;;  %v1497_v17 = vadd.s32 120, %v1450_v2 }
  0x55   : > { %p775_p11 = scmp.ge.s32.totalorder %s244_s27, %s1452_s18 }
  0x57   : > { %776 = sbr.rel (%p775_p11) target bundleno = 377 (0x179), region = 79 }
  0x5e LB: >> { %s830_s22 = sshll.u32 %s1279_s27, 8  ;;  %s1853_s7 = sshll.u32 %s1259_s9, 7  ;;  %v268_v42 = vsub.s32 1, %v1450_v2  ;;  %v1285_v63 = vmov 1.0   ;;  %v264_v0 = vsub.s32 0, %v1450_v2  ;;  %s1279_s27 = sphi %s244_s27, %s249_s27  }
  0x5f   : >> { %s1506_s23 = scalar_lea.vmem [#allocation2], %s830_s22  ;;  %s253_s28 = sshra.s32 %s830_s22, 7  ;;  %v257_v38 = vstv %s1853_s7 }
  0x60   : >> { %v455_v18 = vld [vmem:[%s1506_s23 + $0x80] sm:$0xff]  ;;  %v456_v19 = vld [vmem:[%s1506_s23 + $0x88] sm:$0xff]  ;;  %v457_v23 = vld [vmem:[%s1506_s23 + $0x90] sm:$0xff]  ;;  %s255_s6 = scalar_lea.vmem %s1418_s14, %s253_s28  ;;  %s259_s15 = scalar_lea.vmem %s1423_s21, %s253_s28 }
  0x61   : >> { %v439_v20 = vld [vmem:[%s1506_s23] sm:$0xff]  ;;  %v982_v21 = vpack.c.bf16 %v456_v19, %v455_v18  ;;  %v440_v22 = vld [vmem:[%s1506_s23 + $0x8] sm:$0xff]  ;;  %v458_v24 = vld [vmem:[%s1506_s23 + $0x98] sm:$0xff]  ;;  %s249_s27 = sadd.s32 1, %s1279_s27  }
  0x62   : >> { %v984_v25 = vpack.c.bf16 %v440_v22, %v439_v20  ;;  %v986_v26 = vpack.c.bf16 %v458_v24, %v457_v23  ;;  %v441_v27 = vld [vmem:[%s1506_s23 + $0x10] sm:$0xff]  ;;  %v442_v28 = vld [vmem:[%s1506_s23 + $0x18] sm:$0xff]  ;;  %v459_v29 = vld [vmem:[%s1506_s23 + $0xa0] sm:$0xff]  ;;  %p248_p2 = scmp.ge.s32.totalorder %s249_s27, %s1452_s18 }
  0x63   : >> { %983 = vmatprep.subr.bf16.mxu0 %v982_v21  ;;  %1014 = vmatprep.subr.bf16.mxu1 %v982_v21  ;;  %v460_v30 = vld [vmem:[%s1506_s23 + $0xa8] sm:$0xff]  ;;  %v988_v31 = vpack.c.bf16 %v442_v28, %v441_v27  ;;  %v443_v33 = vld [vmem:[%s1506_s23 + $0x20] sm:$0xff]  ;;  %v461_v35 = vld [vmem:[%s1506_s23 + $0xb0] sm:$0xff] }
  0x64   : >> { %985 = vmatpush3.bf16.msra.mxu0 %v984_v25  ;;  %1022 = vmatpush3.bf16.msra.mxu1 %v984_v25  ;;  %v990_v32 = vpack.c.bf16 %v460_v30, %v459_v29  ;;  %v444_v34 = vld [vmem:[%s1506_s23 + $0x28] sm:$0xff]  ;;  %v462_v36 = vld [vmem:[%s1506_s23 + $0xb8] sm:$0xff]  ;;  %v445_v40 = vld [vmem:[%s1506_s23 + $0x30] sm:$0xff] }
  0x65   : >> { %987 = vmatprep.subr.bf16.mxu0 %v986_v26  ;;  %1015 = vmatprep.subr.bf16.mxu1 %v986_v26  ;;  %v992_v37 = vpack.c.bf16 %v444_v34, %v443_v33  ;;  %v994_v39 = vpack.c.bf16 %v462_v36, %v461_v35  ;;  %v446_v41 = vld [vmem:[%s1506_s23 + $0x38] sm:$0xff]  ;;  %v463_v43 = vld [vmem:[%s1506_s23 + $0xc0] sm:$0xff]  ;;  %v464_v44 = vld [vmem:[%s1506_s23 + $0xc8] sm:$0xff]  ;;  %v1861_v33 = vmov 0  ;;  %v1864_v34 = vmov 0 }
  0x66   : >> { %v256_v45 = vld [vmem:[%s255_s6] sm:$0x3]  ;;  %v996_v48 = vpack.c.bf16 %v446_v41, %v445_v40  ;;  %v998_v50 = vpack.c.bf16 %v464_v44, %v463_v43  ;;  %v448_v52 = vld [vmem:[%s1506_s23 + $0x48] sm:$0xff]  ;;  %v465_v54 = vld [vmem:[%s1506_s23 + $0xd0] sm:$0xff]  ;;  %v1867_v35 = vmov 0 }
  0x67   : >> { %v258_v46 = vsub.s32 %v256_v45, %v257_v38  ;;  %v260_v47 = vld [vmem:[%s259_s15] sm:$0x3]  ;;  %v466_v55 = vld [vmem:[%s1506_s23 + $0xd8] sm:$0xff]  ;;  %v449_v59 = vld [vmem:[%s1506_s23 + $0x50] sm:$0xff] }
  0x68   : >> { %989 = vmatpush3.bf16.msra.mxu0 %v988_v31  ;;  %1023 = vmatpush3.bf16.msra.mxu1 %v988_v31  ;;  %v261_v49 = vsub.s32 %v260_v47, %v257_v38  ;;  %v447_v51 = vld [vmem:[%s1506_s23 + $0x40] sm:$0xff]  ;;  %v1002_v58 = vpack.c.bf16 %v466_v55, %v465_v54  ;;  %v450_v60 = vld [vmem:[%s1506_s23 + $0x58] sm:$0xff]  ;;  %v468_v62 = vld [vmem:[%s1506_s23 + $0xe8] sm:$0xff]  ;;  %v1856_v31 = vmov 0 }
  0x69   : >> { %991 = vmatprep.subr.bf16.mxu0 %v990_v32  ;;  %1016 = vmatprep.subr.bf16.mxu1 %v990_v32  ;;  %v1533_v53 = vrot.slane %v258_v46, %v268_v42  ;;  %v1000_v57 = vpack.c.bf16 %v448_v52, %v447_v51  ;;  %v467_v61 = vld [vmem:[%s1506_s23 + $0xe0] sm:$0xff]  ;;  %v1004_v1 = vpack.c.bf16 %v450_v60, %v449_v59  ;;  %v452_v20 = vld [vmem:[%s1506_s23 + $0x68] sm:$0xff]  ;;  %v469_v21 = vld [vmem:[%s1506_s23 + $0xf0] sm:$0xff]  ;;  %v1858_v32 = vmov 0 }
  0x6a   : >> { %v1537_v56 = vrot.slane %v261_v49, %v268_v42  ;;  %v1006_v18 = vpack.c.bf16 %v468_v62, %v467_v61  ;;  %v451_v19 = vld [vmem:[%s1506_s23 + $0x60] sm:$0xff]  ;;  %v470_v22 = vld [vmem:[%s1506_s23 + $0xf8] sm:$0xff]  ;;  %v1561_v23 = vrot.slane %v258_v46, %v264_v0  ;;  %v1563_v24 = vrot.slane %v261_v49, %v264_v0  ;;  %v453_v27 = vld [vmem:[%s1506_s23 + $0x70] sm:$0xff] }
  0x6b   : >> { %vm271_vm0 = vcmp.ge.s32.totalorder %v1450_v2, %v1533_v53  ;;  %vm287_vm1 = vcmp.ge.s32.totalorder %v1476_v10, %v1533_v53  ;;  %v1008_v25 = vpack.c.bf16 %v452_v20, %v451_v19  ;;  %v1010_v26 = vpack.c.bf16 %v470_v22, %v469_v21  ;;  %v454_v28 = vld [vmem:[%s1506_s23 + $0x78] sm:$0xff]  ;;  %v471_v38 = vld [vmem:[#allocation3] sm:$0xff]  ;;  %v481_v60 = vld [vmem:[#allocation3 + $0x50] sm:$0xff] }
  0x6c   : >> { %993 = vmatpush3.bf16.msra.mxu0 %v992_v37  ;;  %1024 = vmatpush3.bf16.msra.mxu1 %v992_v37  ;;  %vm311_vm2 = vcmp.lt.s32.totalorder %v1450_v2, %v1537_v56  ;;  %vm327_vm3 = vcmp.lt.s32.totalorder %v1476_v10, %v1537_v56  ;;  %vm270_vm6 = vcmp.ge.s32.totalorder %v1450_v2, %v1561_v23  ;;  %v479_v40 = vld [vmem:[#allocation3 + $0x40] sm:$0xff]  ;;  %v474_v20 = vld [vmem:[#allocation3 + $0x18] sm:$0xff] }
  0x6d   : >> { %995 = vmatprep.subr.bf16.mxu0 %v994_v39  ;;  %1017 = vmatprep.subr.bf16.mxu1 %v994_v39  ;;  %vm343_vm4 = vmand %vm271_vm0, %vm311_vm2  ;;  %vm310_vm7 = vcmp.lt.s32.totalorder %v1450_v2, %v1563_v24  ;;  %v1012_v29 = vpack.c.bf16 %v454_v28, %v453_v27  ;;  %vm286_vm8 = vcmp.ge.s32.totalorder %v1476_v10, %v1561_v23  ;;  %v482_v22 = vld [vmem:[#allocation3 + $0x58] sm:$0xff]  ;;  %v475_v30 = vld [vmem:[#allocation3 + $0x20] sm:$0xff] }
  0x6e   : >> { %863 = vmatprep.mubr.msk.f32.mxu0 %vm343_vm4, %v1285_v63  ;;  %vm359_vm5 = vmand %vm287_vm1, %vm327_vm3  ;;  %vm326_vm9 = vcmp.lt.s32.totalorder %v1476_v10, %v1563_v24  ;;  %vm273_vm10 = vcmp.ge.s32.totalorder %v1455_v3, %v1533_v53  ;;  %vm313_vm11 = vcmp.lt.s32.totalorder %v1455_v3, %v1537_v56  ;;  %vm289_vm13 = vcmp.ge.s32.totalorder %v1479_v11, %v1533_v53 }
  0x6f   : >> { %879 = vmatprep.mubr.msk.f32.mxu1 %vm359_vm5, %v1285_v63  ;;  %vm1579_vm12 = vmand %vm270_vm6, %vm310_vm7  ;;  %vm329_vm14 = vcmp.lt.s32.totalorder %v1479_v11, %v1537_v56  ;;  %vm272_vm0 = vcmp.ge.s32.totalorder %v1455_v3, %v1561_v23  ;;  %vm312_vm1 = vcmp.lt.s32.totalorder %v1455_v3, %v1563_v24  ;;  %vm288_vm3 = vcmp.ge.s32.totalorder %v1479_v11, %v1561_v23 }
  0x70   : >> { %997 = vmatpush3.bf16.msra.mxu0 %v996_v48  ;;  %1025 = vmatpush3.bf16.msra.mxu1 %v996_v48  ;;  %vm358_vm15 = vmand %vm286_vm8, %vm326_vm9  ;;  %vm328_vm4 = vcmp.lt.s32.totalorder %v1479_v11, %v1563_v24  ;;  %vm275_vm6 = vcmp.ge.s32.totalorder %v1458_v4, %v1533_v53  ;;  %vm315_vm7 = vcmp.lt.s32.totalorder %v1458_v4, %v1537_v56  ;;  %v472_v48 = vld [vmem:[#allocation3 + $0x8] sm:$0xff] }
  0x71   : >> { %999 = vmatprep.subr.bf16.mxu0 %v998_v50  ;;  %1018 = vmatprep.subr.bf16.mxu1 %v998_v50  ;;  %vm345_vm2 = vmand %vm273_vm10, %vm313_vm11  ;;  %vm291_vm9 = vcmp.ge.s32.totalorder %v1482_v12, %v1533_v53  ;;  %vm331_vm10 = vcmp.lt.s32.totalorder %v1482_v12, %v1537_v56  ;;  %v480_v50 = vld [vmem:[#allocation3 + $0x48] sm:$0xff] }
  0x72   : >> { %vm361_vm5 = vmand %vm289_vm13, %vm329_vm14  ;;  %vm274_vm13 = vcmp.ge.s32.totalorder %v1458_v4, %v1561_v23  ;;  %vm314_vm14 = vcmp.lt.s32.totalorder %v1458_v4, %v1563_v24 }
  0x73   : >> { %vm1599_vm8 = vmand %vm272_vm0, %vm312_vm1  ;;  %vm290_vm1 = vcmp.ge.s32.totalorder %v1482_v12, %v1561_v23 }
  0x74   : >> { %1001 = vmatpush3.bf16.msra.mxu0 %v1000_v57  ;;  %1026 = vmatpush3.bf16.msra.mxu1 %v1000_v57  ;;  %v1857_v31 = vsel %vm1599_vm8, 4294967295, %v1856_v31  ;;  %vm360_vm11 = vmand %vm288_vm3, %vm328_vm4  ;;  %vm317_vm3 = vcmp.lt.s32.totalorder %v1461_v5, %v1537_v56 }
  0x75   : >> { %1003 = vmatprep.subr.bf16.mxu0 %v1002_v58  ;;  %1019 = vmatprep.subr.bf16.mxu1 %v1002_v58  ;;  %vm347_vm0 = vmand %vm275_vm6, %vm315_vm7  ;;  %vm1860_vm6 = vnez %v1857_v31  ;;  %v473_v58 = vld [vmem:[#allocation3 + $0x10] sm:$0xff] }
  0x76   : >> { %vm363_vm8 = vmand %vm291_vm9, %vm331_vm10  ;;  %vm276_vm9 = vcmp.ge.s32.totalorder %v1461_v5, %v1561_v23  ;;  %vm316_vm10 = vcmp.lt.s32.totalorder %v1461_v5, %v1563_v24 }
  0x77   : >> { %vm1625_vm4 = vmand %vm274_vm13, %vm314_vm14  ;;  %vm292_vm14 = vcmp.ge.s32.totalorder %v1485_v13, %v1561_v23 }
  0x78   : >> { %1005 = vmatpush3.bf16.msra.mxu0 %v1004_v1  ;;  %1027 = vmatpush3.bf16.msra.mxu1 %v1004_v1  ;;  %v1859_v32 = vsel %vm1625_vm4, 4294967295, %v1858_v32 }
  0x79   : >> { %1007 = vmatprep.subr.bf16.mxu0 %v1006_v18  ;;  %1020 = vmatprep.subr.bf16.mxu1 %v1006_v18 }
  0x7c   : >> { %1009 = vmatpush3.bf16.msra.mxu0 %v1008_v25  ;;  %1028 = vmatpush3.bf16.msra.mxu1 %v1008_v25 }
  0x7d   : >> { %1011 = vmatprep.subr.bf16.mxu0 %v1010_v26  ;;  %1021 = vmatprep.subr.bf16.mxu1 %v1010_v26 }
  0x80   : >> { %1013 = vmatpush3.bf16.msra.mxu0 %v1012_v29  ;;  %1029 = vmatpush3.bf16.msra.mxu1 %v1012_v29 }
  0x83   : >> { %864 = vmatmul.mubr.msk.f32.vlgmr.msra.gmra.mrb[0].mxu0 %vm1579_vm12, %v1285_v63  ;;  %880 = vmatmul.mubr.msk.f32.vlgmr.msra.gmra.mrb[0].mxu1 %vm358_vm15, %v1285_v63  ;;  %vm330_vm12 = vcmp.lt.s32.totalorder %v1482_v12, %v1563_v24  ;;  %vm277_vm15 = vcmp.ge.s32.totalorder %v1461_v5, %v1533_v53 }
  0x84   : >> { %865 = vmatprep.mubr.msk.f32.mxu0 %vm345_vm2, %v1285_v63  ;;  %881 = vmatprep.mubr.msk.f32.mxu1 %vm361_vm5, %v1285_v63  ;;  %vm293_vm2 = vcmp.ge.s32.totalorder %v1485_v13, %v1533_v53  ;;  %vm333_vm5 = vcmp.lt.s32.totalorder %v1485_v13, %v1537_v56  ;;  %vm362_vm7 = vmand %vm290_vm1, %vm330_vm12  ;;  %vm319_vm1 = vcmp.lt.s32.totalorder %v1464_v6, %v1537_v56 }
  0x85   : >> { %vm349_vm13 = vmand %vm277_vm15, %vm317_vm3  ;;  %vm1863_vm15 = vnez %v1859_v32  ;;  %v483_v32 = vld [vmem:[#allocation3 + $0x60] sm:$0xff] }
  0x86   : >> { %vm365_vm4 = vmand %vm293_vm2, %vm333_vm5  ;;  %vm278_vm2 = vcmp.ge.s32.totalorder %v1464_v6, %v1561_v23  ;;  %vm318_vm5 = vcmp.lt.s32.totalorder %v1464_v6, %v1563_v24 }
  0x87   : >> { %866 = vmatmul.mubr.msk.f32.gmra.mrb[2].mxu0 %vm1860_vm6, %v1285_v63  ;;  %882 = vmatmul.mubr.msk.f32.gmra.mrb[2].mxu1 %vm360_vm11, %v1285_v63  ;;  %vm332_vm6 = vcmp.lt.s32.totalorder %v1485_v13, %v1563_v24  ;;  %vm279_vm11 = vcmp.ge.s32.totalorder %v1464_v6, %v1533_v53  ;;  %vm1651_vm12 = vmand %vm276_vm9, %vm316_vm10  ;;  %vm294_vm10 = vcmp.ge.s32.totalorder %v1488_v14, %v1561_v23 }
  0x88   : >> { %867 = vmatprep.mubr.msk.f32.mxu0 %vm347_vm0, %v1285_v63  ;;  %883 = vmatprep.mubr.msk.f32.mxu1 %vm363_vm8, %v1285_v63  ;;  %v1862_v33 = vsel %vm1651_vm12, 4294967295, %v1861_v33  ;;  %vm295_vm8 = vcmp.ge.s32.totalorder %v1488_v14, %v1533_v53  ;;  %vm335_vm0 = vcmp.lt.s32.totalorder %v1488_v14, %v1537_v56  ;;  %vm364_vm3 = vmand %vm292_vm14, %vm332_vm6  ;;  %vm321_vm14 = vcmp.lt.s32.totalorder %v1467_v7, %v1537_v56 }
  0x89   : >> { %vm351_vm9 = vmand %vm279_vm11, %vm319_vm1  ;;  %vm1866_vm11 = vnez %v1862_v33 }
  0x8a   : >> { %vm367_vm12 = vmand %vm295_vm8, %vm335_vm0  ;;  %vm280_vm8 = vcmp.ge.s32.totalorder %v1467_v7, %v1561_v23  ;;  %vm320_vm0 = vcmp.lt.s32.totalorder %v1467_v7, %v1563_v24 }
  0x8b   : >> { %868 = vmatmul.mubr.msk.f32.gmra.mrb[4].mxu0 %vm1863_vm15, %v1285_v63  ;;  %884 = vmatmul.mubr.msk.f32.gmra.mrb[4].mxu1 %vm362_vm7, %v1285_v63  ;;  %vm334_vm15 = vcmp.lt.s32.totalorder %v1488_v14, %v1563_v24  ;;  %vm281_vm7 = vcmp.ge.s32.totalorder %v1467_v7, %v1533_v53  ;;  %vm1677_vm6 = vmand %vm278_vm2, %vm318_vm5  ;;  %vm296_vm5 = vcmp.ge.s32.totalorder %v1491_v15, %v1561_v23 }
  0x8c   : >> { %869 = vmatprep.mubr.msk.f32.mxu0 %vm349_vm13, %v1285_v63  ;;  %885 = vmatprep.mubr.msk.f32.mxu1 %vm365_vm4, %v1285_v63  ;;  %v1865_v34 = vsel %vm1677_vm6, 4294967295, %v1864_v34  ;;  %vm297_vm4 = vcmp.ge.s32.totalorder %v1491_v15, %v1533_v53  ;;  %vm337_vm13 = vcmp.lt.s32.totalorder %v1491_v15, %v1537_v56  ;;  %vm366_vm1 = vmand %vm294_vm10, %vm334_vm15  ;;  %vm323_vm10 = vcmp.lt.s32.totalorder %v1470_v8, %v1537_v56 }
  0x8d   : >> { %vm353_vm2 = vmand %vm281_vm7, %vm321_vm14  ;;  %vm1869_vm7 = vnez %v1865_v34 }
  0x8e   : >> { %vm369_vm6 = vmand %vm297_vm4, %vm337_vm13  ;;  %vm282_vm4 = vcmp.ge.s32.totalorder %v1470_v8, %v1561_v23  ;;  %vm322_vm13 = vcmp.lt.s32.totalorder %v1470_v8, %v1563_v24 }
  0x8f   : >> { %870 = vmatmul.mubr.msk.f32.gmra.mrb[6].mxu0 %vm1866_vm11, %v1285_v63  ;;  %886 = vmatmul.mubr.msk.f32.gmra.mrb[6].mxu1 %vm364_vm3, %v1285_v63  ;;  %vm336_vm11 = vcmp.lt.s32.totalorder %v1491_v15, %v1563_v24  ;;  %vm283_vm3 = vcmp.ge.s32.totalorder %v1470_v8, %v1533_v53  ;;  %vm1703_vm15 = vmand %vm280_vm8, %vm320_vm0  ;;  %vm298_vm0 = vcmp.ge.s32.totalorder %v1494_v16, %v1561_v23 }
  0x90   : >> { %871 = vmatprep.mubr.msk.f32.mxu0 %vm351_vm9, %v1285_v63  ;;  %887 = vmatprep.mubr.msk.f32.mxu1 %vm367_vm12, %v1285_v63  ;;  %v1868_v35 = vsel %vm1703_vm15, 4294967295, %v1867_v35  ;;  %vm299_vm12 = vcmp.ge.s32.totalorder %v1494_v16, %v1533_v53  ;;  %vm339_vm9 = vcmp.lt.s32.totalorder %v1494_v16, %v1537_v56  ;;  %vm368_vm14 = vmand %vm296_vm5, %vm336_vm11  ;;  %vm325_vm5 = vcmp.lt.s32.totalorder %v1473_v9, %v1537_v56 }
  0x91   : >> { %vm355_vm8 = vmand %vm283_vm3, %vm323_vm10  ;;  %vm1870_vm3 = vnez %v1868_v35 }
  0x92   : >> { %vm371_vm15 = vmand %vm299_vm12, %vm339_vm9  ;;  %vm284_vm9 = vcmp.ge.s32.totalorder %v1473_v9, %v1561_v23 }
  0x93   : >> { %872 = vmatmul.mubr.msk.f32.gmra.mrb[8].mxu0 %vm1869_vm7, %v1285_v63  ;;  %888 = vmatmul.mubr.msk.f32.gmra.mrb[8].mxu1 %vm366_vm1, %v1285_v63  ;;  %vm338_vm7 = vcmp.lt.s32.totalorder %v1494_v16, %v1563_v24  ;;  %vm285_vm1 = vcmp.ge.s32.totalorder %v1473_v9, %v1533_v53  ;;  %vm354_vm11 = vmand %vm282_vm4, %vm322_vm13  ;;  %vm324_vm4 = vcmp.lt.s32.totalorder %v1473_v9, %v1563_v24 }
  0x94   : >> { %873 = vmatprep.mubr.msk.f32.mxu0 %vm353_vm2, %v1285_v63  ;;  %889 = vmatprep.mubr.msk.f32.mxu1 %vm369_vm6, %v1285_v63  ;;  %vm301_vm2 = vcmp.ge.s32.totalorder %v1497_v17, %v1533_v53  ;;  %vm341_vm6 = vcmp.lt.s32.totalorder %v1497_v17, %v1537_v56  ;;  %vm370_vm10 = vmand %vm298_vm0, %vm338_vm7 }
  0x95   : >> { %vm357_vm12 = vmand %vm285_vm1, %vm325_vm5 }
  0x96   : >> { %vm373_vm13 = vmand %vm301_vm2, %vm341_vm6 }
  0x97   : >> { %874 = vmatmul.mubr.msk.f32.gmra.mrb[10].mxu0 %vm1870_vm3, %v1285_v63  ;;  %890 = vmatmul.mubr.msk.f32.gmra.mrb[10].mxu1 %vm368_vm14, %v1285_v63  ;;  %vm300_vm3 = vcmp.ge.s32.totalorder %v1497_v17, %v1561_v23  ;;  %vm340_vm14 = vcmp.lt.s32.totalorder %v1497_v17, %v1563_v24 }
  0x98   : >> { %875 = vmatprep.mubr.msk.f32.mxu0 %vm355_vm8, %v1285_v63  ;;  %891 = vmatprep.mubr.msk.f32.mxu1 %vm371_vm15, %v1285_v63  ;;  %vm356_vm8 = vmand %vm284_vm9, %vm324_vm4 }
  0x99   : >> { %vm372_vm15 = vmand %vm300_vm3, %vm340_vm14 }
  0x9b   : >> { %876 = vmatmul.mubr.msk.f32.gmra.mrb[12].mxu0 %vm354_vm11, %v1285_v63  ;;  %892 = vmatmul.mubr.msk.f32.gmra.mrb[12].mxu1 %vm370_vm10, %v1285_v63 }
  0x9c   : >> { %877 = vmatprep.mubr.msk.f32.mxu0 %vm357_vm12, %v1285_v63  ;;  %893 = vmatprep.mubr.msk.f32.mxu1 %vm373_vm13, %v1285_v63 }
  0x9f   : >> { %878 = vmatmul.mubr.msk.f32.gmra.mrb[14].mxu0 %vm356_vm8, %v1285_v63  ;;  %894 = vmatmul.mubr.msk.f32.gmra.mrb[14].mxu1 %vm372_vm15, %v1285_v63 }
 0x156   : >> { %v934_v36 = vpop.f32.mrb[0].mxu0  ;;  %v958_v37 = vpop.f32.mrb[0].mxu1 }
 0x157   : >> { %v935_v39 = vpop.f32.mrb[1].mxu0  ;;  %v959_v41 = vpop.f32.mrb[1].mxu1 }
 0x158   : >> { %v936_v42 = vadd.f32 %v935_v39, %v934_v36  ;;  %v960_v43 = vadd.f32 %v959_v41, %v958_v37 }
 0x15a   : >> { %v632_v44 = vadd.f32 %v936_v42, %v471_v38  ;;  %v640_v45 = vadd.f32 %v960_v43, %v479_v40  ;;  %v937_v46 = vpop.f32.mrb[2].mxu0  ;;  %v961_v47 = vpop.f32.mrb[2].mxu1  ;;  %v476_v40 = vld [vmem:[#allocation3 + $0x28] sm:$0xff] }
 0x15b   : >> { %v938_v49 = vpop.f32.mrb[3].mxu0  ;;  %v962_v51 = vpop.f32.mrb[3].mxu1  ;;  %v484_v42 = vld [vmem:[#allocation3 + $0x68] sm:$0xff] }
 0x15c   : >> { %648 = vst [vmem:[#allocation3] sm:$0xff] %v632_v44  ;;  %656 = vst [vmem:[#allocation3 + $0x40] sm:$0xff] %v640_v45  ;;  %v939_v52 = vadd.f32 %v938_v49, %v937_v46  ;;  %v963_v53 = vadd.f32 %v962_v51, %v961_v47 }
 0x15e   : >> { %v633_v54 = vadd.f32 %v939_v52, %v472_v48  ;;  %v641_v55 = vadd.f32 %v963_v53, %v480_v50  ;;  %v940_v56 = vpop.f32.mrb[4].mxu0  ;;  %v964_v57 = vpop.f32.mrb[4].mxu1  ;;  %v477_v50 = vld [vmem:[#allocation3 + $0x30] sm:$0xff] }
 0x15f   : >> { %v941_v59 = vpop.f32.mrb[5].mxu0  ;;  %v965_v61 = vpop.f32.mrb[5].mxu1  ;;  %v485_v52 = vld [vmem:[#allocation3 + $0x70] sm:$0xff] }
 0x160   : >> { %649 = vst [vmem:[#allocation3 + $0x8] sm:$0xff] %v633_v54  ;;  %657 = vst [vmem:[#allocation3 + $0x48] sm:$0xff] %v641_v55  ;;  %v942_v62 = vadd.f32 %v941_v59, %v940_v56  ;;  %v966_v63 = vadd.f32 %v965_v61, %v964_v57 }
 0x162   : >> { %v634_v0 = vadd.f32 %v942_v62, %v473_v58  ;;  %v642_v1 = vadd.f32 %v966_v63, %v481_v60  ;;  %v943_v18 = vpop.f32.mrb[6].mxu0  ;;  %v967_v19 = vpop.f32.mrb[6].mxu1  ;;  %v478_v60 = vld [vmem:[#allocation3 + $0x38] sm:$0xff] }
 0x163   : >> { %v944_v21 = vpop.f32.mrb[7].mxu0  ;;  %v968_v23 = vpop.f32.mrb[7].mxu1  ;;  %v486_v62 = vld [vmem:[#allocation3 + $0x78] sm:$0xff] }
 0x164   : >> { %650 = vst [vmem:[#allocation3 + $0x10] sm:$0xff] %v634_v0  ;;  %658 = vst [vmem:[#allocation3 + $0x50] sm:$0xff] %v642_v1  ;;  %v945_v24 = vadd.f32 %v944_v21, %v943_v18  ;;  %v969_v25 = vadd.f32 %v968_v23, %v967_v19 }
 0x166   : >> { %v635_v26 = vadd.f32 %v945_v24, %v474_v20  ;;  %v643_v27 = vadd.f32 %v969_v25, %v482_v22  ;;  %v946_v28 = vpop.f32.mrb[8].mxu0  ;;  %v970_v29 = vpop.f32.mrb[8].mxu1 }
 0x167   : >> { %v947_v31 = vpop.f32.mrb[9].mxu0  ;;  %v971_v33 = vpop.f32.mrb[9].mxu1 }
 0x168   : >> { %651 = vst [vmem:[#allocation3 + $0x18] sm:$0xff] %v635_v26  ;;  %659 = vst [vmem:[#allocation3 + $0x58] sm:$0xff] %v643_v27  ;;  %v948_v34 = vadd.f32 %v947_v31, %v946_v28  ;;  %v972_v35 = vadd.f32 %v971_v33, %v970_v29 }
 0x16a   : >> { %v636_v36 = vadd.f32 %v948_v34, %v475_v30  ;;  %v644_v37 = vadd.f32 %v972_v35, %v483_v32  ;;  %v949_v38 = vpop.f32.mrb[10].mxu0  ;;  %v973_v39 = vpop.f32.mrb[10].mxu1 }
 0x16b   : >> { %v950_v41 = vpop.f32.mrb[11].mxu0  ;;  %v974_v43 = vpop.f32.mrb[11].mxu1 }
 0x16c   : >> { %652 = vst [vmem:[#allocation3 + $0x20] sm:$0xff] %v636_v36  ;;  %660 = vst [vmem:[#allocation3 + $0x60] sm:$0xff] %v644_v37  ;;  %v951_v44 = vadd.f32 %v950_v41, %v949_v38  ;;  %v975_v45 = vadd.f32 %v974_v43, %v973_v39 }
 0x16e   : >> { %v637_v46 = vadd.f32 %v951_v44, %v476_v40  ;;  %v645_v47 = vadd.f32 %v975_v45, %v484_v42  ;;  %v952_v48 = vpop.f32.mrb[12].mxu0  ;;  %v976_v49 = vpop.f32.mrb[12].mxu1 }
 0x16f   : >> { %v953_v51 = vpop.f32.mrb[13].mxu0  ;;  %v977_v53 = vpop.f32.mrb[13].mxu1 }
 0x170   : >> { %653 = vst [vmem:[#allocation3 + $0x28] sm:$0xff] %v637_v46  ;;  %661 = vst [vmem:[#allocation3 + $0x68] sm:$0xff] %v645_v47  ;;  %v954_v54 = vadd.f32 %v953_v51, %v952_v48  ;;  %v978_v55 = vadd.f32 %v977_v53, %v976_v49 }
 0x172   : >> { %v638_v56 = vadd.f32 %v954_v54, %v477_v50  ;;  %v646_v57 = vadd.f32 %v978_v55, %v485_v52  ;;  %v955_v58 = vpop.f32.mrb[14].mxu0  ;;  %v979_v59 = vpop.f32.mrb[14].mxu1  ;;  %251 = sbr.rel (!%p248_p2) target bundleno = 94 (0x5e), region = 85 }
 0x173   : >> { %v956_v61 = vpop.f32.mrb[15].mxu0  ;;  %v980_v63 = vpop.f32.mrb[15].mxu1 }
 0x174   : >> { %654 = vst [vmem:[#allocation3 + $0x30] sm:$0xff] %v638_v56  ;;  %662 = vst [vmem:[#allocation3 + $0x70] sm:$0xff] %v646_v57  ;;  %v957_v0 = vadd.f32 %v956_v61, %v955_v58  ;;  %v981_v1 = vadd.f32 %v980_v63, %v979_v59 }
 0x176   : >> { %v639_v18 = vadd.f32 %v957_v0, %v478_v60  ;;  %v647_v19 = vadd.f32 %v981_v1, %v486_v62 }
 0x178   : >> { %655 = vst [vmem:[#allocation3 + $0x38] sm:$0xff] %v639_v18  ;;  %663 = vst [vmem:[#allocation3 + $0x78] sm:$0xff] %v647_v19 }
 0x179 PF: > { %v664_v20 = vld [vmem:[#allocation3] sm:$0xff]  ;;  %v665_v21 = vld [vmem:[#allocation3 + $0x8] sm:$0xff]  ;;  %v666_v22 = vld [vmem:[#allocation3 + $0x10] sm:$0xff]  ;;  %s896_s17 = sshll.u32 %s1259_s9, 4  ;;  %s1030_s14 = smul.u32 48, %s1263_s10 }
 0x17a   : > { %680 = vst [vmem:[%s1441_s2] sm:$0xff] %v664_v20  ;;  %681 = vst [vmem:[%s1441_s2 + $0x8] sm:$0xff] %v665_v21  ;;  %v667_v2 = vld [vmem:[#allocation3 + $0x18] sm:$0xff]  ;;  %v668_v3 = vld [vmem:[#allocation3 + $0x20] sm:$0xff]  ;;  %s712_s21 = sshll.u32 %s1441_s2, 4  ;;  %s1871_s25 = sand.u32 1, %s1251_s8   ;;  %s1766_s21 = int_to_ptr.vmem [resolvable:$true] %s712_s21 }
 0x17b   : > { %682 = vst [vmem:[%s1441_s2 + $0x10] sm:$0xff] %v666_v22  ;;  %v669_v4 = vld [vmem:[#allocation3 + $0x28] sm:$0xff]  ;;  %683 = vst [vmem:[%s1441_s2 + $0x18] sm:$0xff] %v667_v2  ;;  %v670_v5 = vld [vmem:[#allocation3 + $0x30] sm:$0xff]  ;;  %s709_s9 = sadd.s32 %s1030_s14, %s896_s17  ;;  %s1785_s26 = scalar_lea.sflag [#allocation9], %s1871_s25 }
 0x17c   : > { %684 = vst [vmem:[%s1441_s2 + $0x20] sm:$0xff] %v668_v3  ;;  %685 = vst [vmem:[%s1441_s2 + $0x28] sm:$0xff] %v669_v4  ;;  %v672_v7 = vld [vmem:[#allocation3 + $0x40] sm:$0xff]  ;;  %v673_v8 = vld [vmem:[#allocation3 + $0x48] sm:$0xff]  ;;  %s897_s10 = sshll.u32 %s709_s9, 7  ;;  %s1171_s27 = scalar_lea.vmem %s1766_s21, 2048 }
 0x17d   : > { %686 = vst [vmem:[%s1441_s2 + $0x30] sm:$0xff] %v670_v5  ;;  %688 = vst [vmem:[%s1441_s2 + $0x40] sm:$0xff] %v672_v7  ;;  %v674_v9 = vld [vmem:[#allocation3 + $0x50] sm:$0xff]  ;;  %v675_v10 = vld [vmem:[#allocation3 + $0x58] sm:$0xff]  ;;  %s1780_s30 = scalar_lea.hbm %s1841_s5, %s897_s10  ;;  %p1172_p7 = scmp.ne.s32.totalorder %s1766_s21, %s1171_s27 }
 0x17e   : > { %689 = vst [vmem:[%s1441_s2 + $0x48] sm:$0xff] %v673_v8  ;;  %690 = vst [vmem:[%s1441_s2 + $0x50] sm:$0xff] %v674_v9  ;;  %v676_v11 = vld [vmem:[#allocation3 + $0x60] sm:$0xff]  ;;  %v677_v12 = vld [vmem:[#allocation3 + $0x68] sm:$0xff]  ;;  %p1872_p10 = scmp.ne.s32.totalorder %s1849_s19, 0  ;;  %s1286_s18 = smov [#allocation8]  }
 0x17f   : > { %v671_v6 = vld [vmem:[#allocation3 + $0x38] sm:$0xff]  ;;  %691 = vst [vmem:[%s1441_s2 + $0x58] sm:$0xff] %v675_v10  ;;  %v678_v13 = vld [vmem:[#allocation3 + $0x70] sm:$0xff]  ;;  %692 = vst [vmem:[%s1441_s2 + $0x60] sm:$0xff] %v676_v11  ;;  %s1175_s22 = sshll.u32 %s1286_s18, 4  ;;  %s1176_s22 = int_to_ptr.vmem [resolvable:$false] %s1175_s22 }
 0x180   : > { %687 = vst [vmem:[%s1441_s2 + $0x38] sm:$0xff] %v671_v6  ;;  %693 = vst [vmem:[%s1441_s2 + $0x68] sm:$0xff] %v677_v12  ;;  %v679_v14 = vld [vmem:[#allocation3 + $0x78] sm:$0xff]  ;;  %p1173_p13 = pnand %p1172_p7, %p1872_p10  ;;  %s1177_s23 = scalar_lea.vmem %s1176_s22, 4096 }
 0x181   : > { %694 = vst [vmem:[%s1441_s2 + $0x70] sm:$0xff] %v678_v13  ;;  %695 = vst [vmem:[%s1441_s2 + $0x78] sm:$0xff] %v679_v14  ;;  %p1178_p1 = scmp.lt.s32.totalorder %s1766_s21, %s1176_s22  ;;  %p1179_p3 = scmp.lt.s32.totalorder %s1177_s23, %s1171_s27 }
 0x182   : > { %p1174_p0 = pneg %p1173_p13 }
 0x183   : > { %p1180_p4 = por %p1179_p3, %p1178_p1 }
 0x185   : > { %p1181_p5 = pnand %p1180_p4, %p1174_p0 }
 0x187   : > { %1184 = shalt.err (!%p1181_p5)
}
 0x188   : > { %s1185_s2 = scalar_lea.hbm %s1780_s30, 2048  ;;  %s1189_s7 = scalar_lea.hbm %s1841_s5, 12288 }
 0x189   : > { %p1186_p6 = scmp.ne.s32.totalorder %s1780_s30, %s1185_s2  ;;  %p1190_p12 = scmp.lt.u32.totalorder %s1780_s30, %s1841_s5 }
 0x18a   : > { %p1191_p11 = scmp.lt.u32.totalorder %s1189_s7, %s1185_s2  ;;  %p1193_p7 = scmp.lt.u32.totalorder %s1185_s2, %s1780_s30 }
 0x18b   : > { %p1187_p8 = pnand %p1186_p6, %p1872_p10 }
 0x18c   : > { %p1192_p2 = por %p1191_p11, %p1190_p12 }
 0x18d   : > { %p1188_p9 = pneg %p1187_p8 }
 0x18e   : > { %p1194_p13 = por %p1193_p7, %p1192_p2 }
 0x190   : > { %p1195_p0 = pnand %p1194_p13, %p1188_p9 }
 0x192   : > { %1198 = shalt.err (!%p1195_p0)
}
 0x193   : > { %s1287_s14 = smov 128   ;;  %s1288_s9 = smov 8  }
 0x194   : > { %1034 = dma.vmem_to_hbm [thread:$0]  (%p1872_p10), %s1766_s21, 2048, %s1780_s30, %s1785_s26, %s1287_s14, %s1287_s14, %s1288_s9  }
 0x195 PF: > { %p1041_p1 = scmp.ge.s32.totalorder %s1275_s13, 2  ;;  %s727_s10 = sand.u32 1, %s1247_s0  }
 0x196   : > { %p1873_p3 = scmp.ne.s32.totalorder %s1851_s20, 0  ;;  %s728_s16 = scalar_lea.sflag [#allocation9], %s727_s10 }
 0x198   : > { %p1037_p4 = pnand %p1041_p1, %p1873_p3 }
 0x19a   : > { %1242 = dma.done.wait (!%p1037_p4), %s728_s16, 2048  }
 0x19b   : > { %1244 = vsyncadd (!%p1037_p4), %s728_s16, 4294965248  ;;  %s26_s13 = sadd.s32 1, %s1275_s13   ;;  %s1874_s19 = sld [smem:[#allocation17_spill]] }
 0x19c   : > { %p23_p5 = scmp.ge.s32.totalorder %s26_s13, 8   ;;  %s1875_s21 = sld [smem:[#allocation18_spill]] }
 0x19d   : > { %s1876_s0 = smov %s1251_s8  ;;  %s1877_s8 = smov %s1255_s1 }
 0x19e   : > { %s1878_s1 = smov %s1403_s24  ;;  %s1879_s9 = smov %s1267_s11 }
 0x19f   : > { %s1880_s10 = smov %s1271_s12  ;;  %25 = sbr.rel (!%p23_p5) target bundleno = 27 (0x1b), region = 96 }
 0x1a1   : > { %s1881_s11 = smov %s1874_s19 }
 0x1a2   : > { %s1882_s12 = smov %s1875_s21 }
 0x1a6   :  { %733 = vsyncpa [#allocation9], 1 }
 0x1a7   :  { %735 = vsyncpa [#allocation9 + $0x1], 1 }
 0x1a8   :  { %736 = vsyncmov [#allocation4] }
 0x1ab   :  { %s737_s20 = vpop.sfrf %736 }
 0x1ac   :  { %p900_p10 = scmp.ne.s32.totalorder %s737_s20, 0 }
 0x1ae   :  { %741 = shalt.err (%p900_p10)  }

</bundles_post_ra>
